<compile_context>
chip_gen: v6e
topology: v6e:2x2x1
jax: 0.10.0
libtpu: 0.0.40
codegen_flags: <defaults>
</compile_context>

<pallas_src>
import functools

import jax
import jax.numpy as jnp
from jax import lax
from jax.experimental import pallas as pl
from jax.experimental.pallas import tpu as pltpu


def _basenet_kernel(x_ref, w1_ref, b1_ref, w2_ref, b2_ref, w3_ref, b3_ref, o_ref):
    # x_ref : (BM, D_in)   — one batch tile
    # w1_ref: (D_in, H1)   b1_ref: (1, H1)  f32
    # w2_ref: (H1, H2)     b2_ref: (1, H2)  f32
    # w3_ref: (1, H2)      — final layer weight stored as a row
    # b3_ref: (1,) in SMEM — final bias scalar
    # o_ref : (1, BM)      — lane-dense output tile (batch on the lane axis)
    x = x_ref[...]

    h1 = jnp.dot(x, w1_ref[...], preferred_element_type=jnp.float32) + b1_ref[...]
    h1 = jnp.maximum(h1, 0.0)                      # f32 elementwise (v5e-safe)

    h2 = jnp.dot(h1.astype(w2_ref.dtype), w2_ref[...],
                 preferred_element_type=jnp.float32) + b2_ref[...]
    h2 = jnp.maximum(h2, 0.0)

    # Final H2 -> 1 layer: contract H2 with the weight row as LHS so the result is
    # (1, BM), i.e. batch lands on lanes and the store is a dense unmasked vst.
    out = lax.dot_general(
        w3_ref[...], h2.astype(w3_ref.dtype),
        dimension_numbers=(((1,), (1,)), ((), ())),
        preferred_element_type=jnp.float32,
    ) + b3_ref[0]
    o_ref[...] = out.astype(o_ref.dtype)


@functools.partial(jax.jit, static_argnames=("block_m", "mxu_dtype"))
def basenet_forward(x, params, block_m=None, mxu_dtype=None):
    """x: (B, input_dim) float32.  params: (w1, b1, w2, b2, w3, b3).

    block_m:   batch-tile rows (None -> whole batch if B<=512 else 512).
    mxu_dtype: optional dtype (e.g. jnp.bfloat16) for MXU inputs on v6e/v7x;
               biases / ReLU / accumulation stay float32.
    """
    w1, b1, w2, b2, w3, b3 = params
    B, d_in = x.shape
    h1 = w1.shape[1]
    h2 = w2.shape[1]

    if block_m is None:
        block_m = B if B <= 512 else 512

    n_blocks = pl.cdiv(B, block_m)
    B_pad = n_blocks * block_m
    if B_pad != B:
        x = jnp.pad(x, ((0, B_pad - B), (0, 0)))   # pad rows are computed & discarded

    # Layout plumbing: w3 as a row, b3 as an SMEM scalar.
    w3_row = w3.reshape(1, h2)
    b3_s = b3.reshape(1).astype(jnp.float32)

    if mxu_dtype is not None:                      # optional bf16 MXU inputs
        x = x.astype(mxu_dtype)
        w1 = w1.astype(mxu_dtype)
        w2 = w2.astype(mxu_dtype)
        w3_row = w3_row.astype(mxu_dtype)

    bcast = lambda shape: pl.BlockSpec(shape, lambda i: (0, 0))   # weights resident

    out = pl.pallas_call(
        _basenet_kernel,
        out_shape=jax.ShapeDtypeStruct((1, B_pad), jnp.float32),
        grid_spec=pltpu.PrefetchScalarGridSpec(
            num_scalar_prefetch=0,
            grid=(n_blocks,),
            in_specs=[
                pl.BlockSpec((block_m, d_in), lambda i: (i, 0)),    # x tile
                bcast((d_in, h1)),                                  # w1
                bcast((1, h1)),                                     # b1
                bcast((h1, h2)),                                    # w2
                bcast((1, h2)),                                     # b2
                bcast((1, h2)),                                     # w3 row
                pl.BlockSpec(memory_space=pltpu.MemorySpace.SMEM),  # b3 scalar
            ],
            out_specs=pl.BlockSpec((1, block_m), lambda i: (0, i)),
        ),
        compiler_params=pltpu.CompilerParams(
            dimension_semantics=("parallel",),
        ),
    )(x, w1, b1, w2, b2, w3_row, b3_s)

    return out.reshape(B_pad, 1)[:B]


def init_basenet_params(key, input_dim, hidden_dims=(128, 64)):
    """PyTorch-style nn.Linear init (U[-1/sqrt(fan_in), 1/sqrt(fan_in)]);
    weights stored as (in_features, out_features)."""
    dims = [input_dim, *hidden_dims, 1]
    params = []
    for i in range(len(dims) - 1):
        fan_in, fan_out = dims[i], dims[i + 1]
        key, kw, kb = jax.random.split(key, 3)
        bound = 1.0 / (fan_in ** 0.5)
        w = jax.random.uniform(kw, (fan_in, fan_out), jnp.float32, -bound, bound)
        b = jax.random.uniform(kb, (1, fan_out), jnp.float32, -bound, bound)
        params += [w, b]
    return tuple(params)


def basenet_reference(x, params):
    w1, b1, w2, b2, w3, b3 = params
    h1 = jnp.maximum(x @ w1 + b1, 0.0)
    h2 = jnp.maximum(h1 @ w2 + b2, 0.0)
    return h2 @ w3 + b3


if __name__ == "__main__":
    key = jax.random.PRNGKey(0)
    k_params, k_x1, k_x2 = jax.random.split(key, 3)

    input_dim = 32
    hidden_dims = (128, 64)
    params = init_basenet_params(k_params, input_dim, hidden_dims)

    # Small batch: single grid step, whole batch as one tile.
    x_small = jax.random.normal(k_x1, (8, input_dim), jnp.float32)
    out_small = jax.block_until_ready(basenet_forward(x_small, params))
    assert out_small.shape == (8, 1), out_small.shape
    assert jnp.allclose(out_small, basenet_reference(x_small, params),
                        atol=1e-5, rtol=1e-5), "mismatch vs reference (small batch)"

    # Larger non-multiple batch: exercises 512-row tiles, padding, 2 parallel steps.
    x_big = jax.random.normal(k_x2, (1000, input_dim), jnp.float32)
    out_big = jax.block_until_ready(basenet_forward(x_big, params))
    assert out_big.shape == (1000, 1), out_big.shape
    assert jnp.allclose(out_big, basenet_reference(x_big, params),
                        atol=1e-4, rtol=1e-4), "mismatch vs reference (large batch)"

    print("KERNEL_OK")
</pallas_src>

<mosaic_0001>
module attributes {stable_mosaic.version = 11 : i64} {
  func.func @_basenet_kernel(%arg0: i32, %arg1: memref<8x32xf32, #tpu.memory_space<vmem>>, %arg2: memref<32x128xf32, #tpu.memory_space<vmem>>, %arg3: memref<1x128xf32, #tpu.memory_space<vmem>>, %arg4: memref<128x64xf32, #tpu.memory_space<vmem>>, %arg5: memref<1x64xf32, #tpu.memory_space<vmem>>, %arg6: memref<1x64xf32, #tpu.memory_space<vmem>>, %arg7: memref<1xf32, #tpu.memory_space<smem>>, %arg8: memref<1x8xf32, #tpu.memory_space<vmem>>) attributes {dimension_semantics = [#tpu.dimension_semantics<parallel>], iteration_bounds = array<i64: 1>, scalar_prefetch = 0 : i64, scratch_operands = 0 : i64, tpu.core_type = #tpu.core_type<tc>, window_params = [{transform_indices = @transform_0, window_bounds = array<i64: 8, 32>}, {pipeline_mode = #tpu.pipeline_mode<synchronous>, transform_indices = @transform_1, window_bounds = array<i64: 32, 128>}, {pipeline_mode = #tpu.pipeline_mode<synchronous>, transform_indices = @transform_2, window_bounds = array<i64: 1, 128>}, {pipeline_mode = #tpu.pipeline_mode<synchronous>, transform_indices = @transform_3, window_bounds = array<i64: 128, 64>}, {pipeline_mode = #tpu.pipeline_mode<synchronous>, transform_indices = @transform_4, window_bounds = array<i64: 1, 64>}, {pipeline_mode = #tpu.pipeline_mode<synchronous>, transform_indices = @transform_5, window_bounds = array<i64: 1, 64>}, {transform_indices = @transform_6, window_bounds = array<i64: 1>}, {transform_indices = @transform_7, window_bounds = array<i64: 1, 8>}]} {
    %c0 = arith.constant 0 : index
    %c0_0 = arith.constant 0 : index
    %0 = vector.load %arg1[%c0, %c0_0] : memref<8x32xf32, #tpu.memory_space<vmem>>, vector<8x32xf32>
    %c0_1 = arith.constant 0 : index
    %c0_2 = arith.constant 0 : index
    %1 = vector.load %arg2[%c0_1, %c0_2] : memref<32x128xf32, #tpu.memory_space<vmem>>, vector<32x128xf32>
    %cst = arith.constant dense<0.000000e+00> : vector<8x128xf32>
    %2 = tpu.matmul %0, %1, %cst {dimension_numbers = #tpu.dot_dimension_numbers<[1], [0], [0], [1], [0, 0, 1, 1], [], []>} : vector<8x32xf32>, vector<32x128xf32>, vector<8x128xf32> -> vector<8x128xf32>
    %c0_3 = arith.constant 0 : index
    %c0_4 = arith.constant 0 : index
    %3 = vector.load %arg3[%c0_3, %c0_4] : memref<1x128xf32, #tpu.memory_space<vmem>>, vector<1x128xf32>
    %4 = vector.broadcast %3 : vector<1x128xf32> to vector<8x128xf32>
    %5 = arith.addf %2, %4 : vector<8x128xf32>
    %cst_5 = arith.constant 0.000000e+00 : f32
    %6 = vector.broadcast %cst_5 : f32 to vector<8x128xf32>
    %7 = arith.maximumf %5, %6 : vector<8x128xf32>
    %c0_6 = arith.constant 0 : index
    %c0_7 = arith.constant 0 : index
    %8 = vector.load %arg4[%c0_6, %c0_7] : memref<128x64xf32, #tpu.memory_space<vmem>>, vector<128x64xf32>
    %cst_8 = arith.constant dense<0.000000e+00> : vector<8x64xf32>
    %9 = tpu.matmul %7, %8, %cst_8 {dimension_numbers = #tpu.dot_dimension_numbers<[1], [0], [0], [1], [0, 0, 1, 1], [], []>} : vector<8x128xf32>, vector<128x64xf32>, vector<8x64xf32> -> vector<8x64xf32>
    %c0_9 = arith.constant 0 : index
    %c0_10 = arith.constant 0 : index
    %10 = vector.load %arg5[%c0_9, %c0_10] : memref<1x64xf32, #tpu.memory_space<vmem>>, vector<1x64xf32>
    %11 = vector.broadcast %10 : vector<1x64xf32> to vector<8x64xf32>
    %12 = arith.addf %9, %11 : vector<8x64xf32>
    %cst_11 = arith.constant 0.000000e+00 : f32
    %13 = vector.broadcast %cst_11 : f32 to vector<8x64xf32>
    %14 = arith.maximumf %12, %13 : vector<8x64xf32>
    %c0_12 = arith.constant 0 : index
    %c0_13 = arith.constant 0 : index
    %15 = vector.load %arg6[%c0_12, %c0_13] : memref<1x64xf32, #tpu.memory_space<vmem>>, vector<1x64xf32>
    %cst_14 = arith.constant dense<0.000000e+00> : vector<1x8xf32>
    %16 = tpu.matmul %15, %14, %cst_14 {dimension_numbers = #tpu.dot_dimension_numbers<[1], [1], [0], [0], [0, 0, 1, 0], [], []>} : vector<1x64xf32>, vector<8x64xf32>, vector<1x8xf32> -> vector<1x8xf32>
    %c0_15 = arith.constant 0 : index
    %17 = memref.load %arg7[%c0_15] : memref<1xf32, #tpu.memory_space<smem>>
    %18 = vector.broadcast %17 : f32 to vector<1x8xf32>
    %19 = arith.addf %16, %18 : vector<1x8xf32>
    %c0_16 = arith.constant 0 : index
    %c0_17 = arith.constant 0 : index
    %20 = vector.load %arg8[%c0_16, %c0_17] : memref<1x8xf32, #tpu.memory_space<vmem>>, vector<1x8xf32>
    tpu.vector_store %arg8[%c0_16, %c0_17], %19 {strides = array<i32>} : memref<1x8xf32, #tpu.memory_space<vmem>>, vector<1x8xf32>,
    return
  }
  func.func @transform_0(%arg0: i32) -> (i32, i32) {
    %c0_i32 = arith.constant 0 : i32
    %c0_i32_0 = arith.constant 0 : i32
    return %arg0, %c0_i32 : i32, i32
  }
  func.func @transform_1(%arg0: i32) -> (i32, i32) {
    %c0_i32 = arith.constant 0 : i32
    %c0_i32_0 = arith.constant 0 : i32
    %c0_i32_1 = arith.constant 0 : i32
    return %c0_i32, %c0_i32_0 : i32, i32
  }
  func.func @transform_2(%arg0: i32) -> (i32, i32) {
    %c0_i32 = arith.constant 0 : i32
    %c0_i32_0 = arith.constant 0 : i32
    %c0_i32_1 = arith.constant 0 : i32
    return %c0_i32, %c0_i32_0 : i32, i32
  }
  func.func @transform_3(%arg0: i32) -> (i32, i32) {
    %c0_i32 = arith.constant 0 : i32
    %c0_i32_0 = arith.constant 0 : i32
    %c0_i32_1 = arith.constant 0 : i32
    return %c0_i32, %c0_i32_0 : i32, i32
  }
  func.func @transform_4(%arg0: i32) -> (i32, i32) {
    %c0_i32 = arith.constant 0 : i32
    %c0_i32_0 = arith.constant 0 : i32
    %c0_i32_1 = arith.constant 0 : i32
    return %c0_i32, %c0_i32_0 : i32, i32
  }
  func.func @transform_5(%arg0: i32) -> (i32, i32) {
    %c0_i32 = arith.constant 0 : i32
    %c0_i32_0 = arith.constant 0 : i32
    %c0_i32_1 = arith.constant 0 : i32
    return %c0_i32, %c0_i32_0 : i32, i32
  }
  func.func @transform_6(%arg0: i32) -> i32 {
    %c0_i32 = arith.constant 0 : i32
    %c0_i32_0 = arith.constant 0 : i32
    return %c0_i32 : i32
  }
  func.func @transform_7(%arg0: i32) -> (i32, i32) {
    %c0_i32 = arith.constant 0 : i32
    %c0_i32_0 = arith.constant 0 : i32
    return %c0_i32, %arg0 : i32, i32
  }
}

</mosaic_0001>

<bundles_post_ra>
// kernel: basenet_forward.1
= control target key start
LH: loop header
LB: loop body
LE: loop exit
PB: predicated region body
PF: predicated region fallthrough
CT: control target
= control target key end

     0   :  { %v410_v1 = vmov 0.0   ;;  %vm411_vm0 = vmmov 0   ;;  %vm40_vm1 = vcmask 261120   ;;  %s558_s0 = inlined_call_operand.vmem [shape: f32[8,32], index: 0, kind: input, shape index: {}]   ;;  %s559_s1 = inlined_call_operand.vmem [shape: f32[32,128], index: 1, kind: input, shape index: {}]   ;;  %s560_s2 = inlined_call_operand.vmem [shape: f32[1,128], index: 2, kind: input, shape index: {}]   ;;  %s561_s3 = inlined_call_operand.vmem [shape: f32[128,64], index: 3, kind: input, shape index: {}]   ;;  %s562_s4 = inlined_call_operand.vmem [shape: f32[1,64], index: 4, kind: input, shape index: {}]   ;;  %s563_s5 = inlined_call_operand.vmem [shape: f32[1,64], index: 5, kind: input, shape index: {}]   ;;  %s564_s6 = inlined_call_operand.<no memory space> [shape: f32[1], index: 6, kind: input, shape index: {}]   ;;  %s565_s7 = inlined_call_operand.hbm [shape: f32[1,8], index: 7, kind: output, shape index: {}]  }
   0x1   :  { %v32_v0 = vld [vmem:[%s559_s1 + $0x18] sm:$0xff]  ;;  %334 = vmatprep.subr.mxu0 %v410_v1  ;;  %v31_v2 = vld [vmem:[%s559_s1 + $0x10] sm:$0xff]  ;;  %342 = vmatprep.mubr.msk.f32.mxu0 %vm411_vm0, %v410_v1  ;;  %v30_v5 = vld [vmem:[%s559_s1 + $0x8] sm:$0xff] }
   0x2   :  { %v130_v3 = vld [vmem:[%s561_s3 + $0x78] sm:$0xff]  ;;  %335 = vmatpush3.msra.mxu0 %v32_v0  ;;  %345 = vmatprep.subr.mxu1 %v410_v1  ;;  %v129_v4 = vld [vmem:[%s561_s3 + $0x70] sm:$0xff]  ;;  %v128_v6 = vld [vmem:[%s561_s3 + $0x68] sm:$0xff] }
   0x3   :  { %336 = vmatprep.subr.mxu0 %v410_v1  ;;  %346 = vmatpush3.msra.mxu1 %v130_v3  ;;  %v29_v7 = vld [vmem:[%s559_s1] sm:$0xff] }
   0x4   :  { %337 = vmatpush3.msra.mxu0 %v31_v2  ;;  %347 = vmatprep.subr.mxu1 %v410_v1  ;;  %v28_v8 = vld [vmem:[%s558_s0] sm:$0xff] }
   0x5   :  { %338 = vmatprep.subr.mxu0 %v410_v1  ;;  %348 = vmatpush3.msra.mxu1 %v129_v4  ;;  %v127_v9 = vld [vmem:[%s561_s3 + $0x60] sm:$0xff] }
   0x6   :  { %339 = vmatpush3.msra.mxu0 %v30_v5  ;;  %349 = vmatprep.subr.mxu1 %v410_v1 }
   0x7   :  { %13 = vsyncpa [#allocation4], 0  ;;  %340 = vmatprep.subr.mxu0 %v410_v1  ;;  %350 = vmatpush3.msra.mxu1 %v128_v6  ;;  %v126_v10 = vld [vmem:[%s561_s3 + $0x58] sm:$0xff]  ;;  %v125_v11 = vld [vmem:[%s561_s3 + $0x50] sm:$0xff]  ;;  %vm212_vm2 = vcmask 523264   ;;  %v211_v33 = vstv %s564_s6  ;;  %s412_s22 = smov [#allocation3]  }
   0x8   :  { %341 = vmatpush3.msra.mxu0 %v29_v7  ;;  %351 = vmatprep.subr.mxu1 %v410_v1  ;;  %v124_v12 = vld [vmem:[%s561_s3 + $0x48] sm:$0xff]  ;;  %v123_v13 = vld [vmem:[%s561_s3 + $0x40] sm:$0xff]  ;;  %v122_v14 = vld [vmem:[%s561_s3 + $0x38] sm:$0xff]  ;;  %s297_s23 = sshll.u32 %s412_s22, 4  ;;  %vm289_vm3 = vcmask 57344   ;;  %s298_s23 = int_to_ptr.vmem [resolvable:$true] %s297_s23 }
   0x9   :  { %343 = vmatmul.mubr.msk.f32.vlgmr.msra.gmra.mxu0 %vm40_vm1, %v28_v8  ;;  %352 = vmatpush3.msra.mxu1 %v127_v9  ;;  %v121_v15 = vld [vmem:[%s561_s3 + $0x30] sm:$0xff]  ;;  %v120_v16 = vld [vmem:[%s561_s3 + $0x28] sm:$0xff]  ;;  %v119_v17 = vld [vmem:[%s561_s3 + $0x20] sm:$0xff]  ;;  %s392_s24 = scalar_lea.vmem %s298_s23, 32  ;;  %p393_p1 = scmp.lt.s32.totalorder %s298_s23, %s298_s23 }
   0xa   :  { %353 = vmatprep.subr.mxu1 %v410_v1  ;;  %377 = vmatprep.mubr.msk.f32.mxu1 %vm411_vm0, %v410_v1  ;;  %v118_v18 = vld [vmem:[%s561_s3 + $0x18] sm:$0xff]  ;;  %v117_v19 = vld [vmem:[%s561_s3 + $0x10] sm:$0xff]  ;;  %v116_v20 = vld [vmem:[%s561_s3 + $0x8] sm:$0xff] }
   0xb   :  { %354 = vmatpush3.msra.mxu1 %v126_v10  ;;  %380 = vmatprep.subr.mxu0 %v410_v1  ;;  %v115_v21 = vld [vmem:[%s561_s3] sm:$0xff] }
   0xc   :  { %355 = vmatprep.subr.mxu1 %v410_v1  ;;  %382 = vmatprep.mubr.msk.f32.mxu0 %vm411_vm0, %v410_v1  ;;  %v305_v22 = vld [vmem:[%s560_s2] ss:$0 sm:$0xff] }
   0xd   :  { %356 = vmatpush3.msra.mxu1 %v125_v11  ;;  %v307_v27 = vld [vmem:[%s562_s4] ss:$0 sm:$0xff]  ;;  %s388_s4 = scalar_lea.vmem %s298_s23, 16 }
   0xe   :  { %357 = vmatprep.subr.mxu1 %v410_v1  ;;  %v209_v32 = vld [vmem:[%s563_s5] sm:$0x1]  ;;  %p389_p0 = scmp.ne.s32.totalorder %s298_s23, %s388_s4  ;;  %p394_p2 = scmp.lt.s32.totalorder %s392_s24, %s388_s4 }
   0xf   :  { %358 = vmatpush3.msra.mxu1 %v124_v12 }
  0x10   :  { %359 = vmatprep.subr.mxu1 %v410_v1  ;;  %p395_p3 = por %p394_p2, %p393_p1 }
  0x11   :  { %360 = vmatpush3.msra.mxu1 %v123_v13 }
  0x12   :  { %361 = vmatprep.subr.mxu1 %v410_v1  ;;  %p396_p4 = pnand %p395_p3, %p389_p0 }
  0x13   :  { %362 = vmatpush3.msra.mxu1 %v122_v14 }
  0x14   :  { %363 = vmatprep.subr.mxu1 %v410_v1 }
  0x15   :  { %364 = vmatpush3.msra.mxu1 %v121_v15 }
  0x16   :  { %365 = vmatprep.subr.mxu1 %v410_v1 }
  0x17   :  { %366 = vmatpush3.msra.mxu1 %v120_v16 }
  0x18   :  { %367 = vmatprep.subr.mxu1 %v410_v1 }
  0x19   :  { %368 = vmatpush3.msra.mxu1 %v119_v17 }
  0x1a   :  { %369 = vmatprep.subr.mxu1 %v410_v1 }
  0x1b   :  { %370 = vmatpush3.msra.mxu1 %v118_v18 }
  0x1c   :  { %371 = vmatprep.subr.mxu1 %v410_v1 }
  0x1d   :  { %372 = vmatpush3.msra.mxu1 %v117_v19 }
  0x1e   :  { %373 = vmatprep.subr.mxu1 %v410_v1 }
  0x1f   :  { %374 = vmatpush3.msra.mxu1 %v116_v20 }
  0x20   :  { %375 = vmatprep.subr.mxu1 %v410_v1 }
  0x21   :  { %376 = vmatpush3.msra.mxu1 %v115_v21 }
  0xc9   :  { %v110_v23 = vpop.f32.mrf.mxu0 }
  0xca   :  { %v111_v24 = vadd.f32 %v305_v22, %v110_v23 }
  0xcb   :  { %v344_v25 = vpop.f32.mrf.mxu0 }
  0xcc   :  { %v114_v26 = vmax.f32 %v111_v24, 0.0 }
  0xce   :  { %378 = vmatmul.mubr.f32.vlgmr.msra.gmra.mxu1 %v114_v26 }
 0x18e   :  { %v204_v28 = vpop.f32.mrf.mxu1 }
 0x18f   :  { %v205_v29 = vadd.f32 %v307_v27, %v204_v28 }
 0x190   :  { %v379_v30 = vpop.f32.mrf.mxu1 }
 0x191   :  { %v208_v31 = vmax.f32 %v205_v29, 0.0 }
 0x193   :  { %381 = vmatpush3.xpose.msk.msra.mxu0 %vm212_vm2, %v208_v31 }
 0x196   :  { %383 = vmatmul.mubr.msk.f32.vlgmr.msra.gmra.mxu0 %vm212_vm2, %v209_v32 }
 0x256   :  { %v285_v34 = vpop.f32.mrf.mxu0 }
 0x257   :  { %v286_v35 = vadd.f32 %v285_v34, %v211_v33 }
 0x258   :  { %v384_v36 = vpop.f32.mrf.mxu0 }
 0x259   :  { %290 = vst.msk [vmem:[#allocation3] sm:$0x1] %vm289_vm3, %v286_v35 }
 0x25a   :  { %399 = shalt.err (!%p396_p4)
}
 0x25b   :  { %300 = dma.vmem_to_hbm [thread:$0]  %s298_s23, 16, %s565_s7, [#allocation4]  }
 0x25c   :  { %408 = dma.done.wait [#allocation4], 16  }
 0x25d   :  { %409 = vsyncadd [#allocation4], 4294967280 }
 0x25e   :  { %304 = vsyncpa [#allocation4], 1 }

</bundles_post_ra>
